<compile_context>
chip_gen: v7x
topology: tpu7x:2x2x1
jax: 0.10.0
libtpu: 0.0.40
codegen_flags: <defaults>
</compile_context>

<pallas_src>
import math

import jax
import jax.numpy as jnp
import numpy as np
from jax.experimental import pallas as pl
from jax.experimental.pallas import tpu as pltpu

# ---------------- problem sizes (small, consistent with the module) ----------
B = 2          # batch
C_IN = 4       # in_channel
C_OUT = 8      # out_channel
K = 3          # kernel_size
STYLE = 32     # style_dim
H = W = 16     # spatial
PAD = K // 2
KK = K * K
HW = H * W
KKC = KK * C_IN

CONV_SCALE = 1.0 / math.sqrt(C_IN * K * K)   # ModulatedConv2d.scale
MOD_SCALE = 1.0 / math.sqrt(STYLE)           # EqualLinear.scale (lr_mul = 1)
LRELU_SLOPE = 0.2
LRELU_SCALE = math.sqrt(2.0)                 # FusedLeakyReLU scale
EPS = 1e-8

_HIGHEST = jax.lax.Precision.HIGHEST


def styled_conv_kernel(cols_ref, style_ref, wlin_ref, blin_ref, w_ref,
                       noise_ref, nw_ref, bact_ref, out_ref):
    """Single grid step; processes the whole batch out of VMEM.

    cols_ref : (B*KKC, HW) f32   im2col columns, row = b*KKC + tap*C_IN + cin
    style_ref: (B, STYLE)  f32   raw style vectors
    wlin_ref : (STYLE, KKC) f32  EqualLinear weight^T * MOD_SCALE, tiled over taps
    blin_ref : (1, KKC)    f32   EqualLinear bias, tiled over taps
    w_ref    : (C_OUT, KKC) f32  flattened conv weight * CONV_SCALE (tap-major)
    noise_ref: (B, HW)     f32
    nw_ref   : (1, 1) f32 SMEM   NoiseInjection.weight
    bact_ref : (C_OUT, 1)  f32   FusedLeakyReLU.bias
    out_ref  : (B, C_OUT, HW) f32
    """
    f32 = jnp.float32

    # ---- EqualLinear modulation, already tiled over the 9 taps: (B, KKC) ----
    s_tiled = jnp.dot(style_ref[...], wlin_ref[...],
                      preferred_element_type=f32,
                      precision=_HIGHEST) + blin_ref[...]

    # ---- modulate + demodulate, vectorized over the batch --------------------
    w_base = w_ref[...]                                        # (C_OUT, KKC)
    wm = w_base[None, :, :] * s_tiled[:, None, :]              # (B, C_OUT, KKC)
    demod = jax.lax.rsqrt(jnp.sum(wm * wm, axis=-1, keepdims=True) + EPS)
    wm = wm * demod                                            # (B, C_OUT, KKC)

    # ---- block-diagonal weight -> ONE MXU matmul for the whole batch ---------
    zeros_blk = jnp.zeros((C_OUT, KKC), f32)
    w_bd = jnp.concatenate(
        [jnp.concatenate([wm[b] if j == b else zeros_blk for j in range(B)],
                         axis=1)
         for b in range(B)],
        axis=0)                                                # (B*C_OUT, B*KKC)

    acc = jnp.dot(w_bd, cols_ref[...],
                  preferred_element_type=f32,
                  precision=_HIGHEST)                          # (B*C_OUT, HW)

    # ---- noise injection + FusedLeakyReLU epilogue ---------------------------
    noise_scaled = nw_ref[0, 0] * noise_ref[...]               # (B, HW), hoisted
    bact = bact_ref[...]                                       # (C_OUT, 1)
    for b in range(B):                                         # tiny static unroll
        y = acc[b * C_OUT:(b + 1) * C_OUT, :] + noise_scaled[b:b + 1, :] + bact
        out_ref[b] = jnp.maximum(y, LRELU_SLOPE * y) * LRELU_SCALE


def styled_conv(x, style, noise, w_mod, b_mod, w_conv, noise_w, b_act):
    """x: (B, C_IN, H, W) NCHW, style: (B, STYLE), noise: (B, 1, H, W)."""
    # --- parameter prep (tiny, constant-foldable by XLA) ----------------------
    # EqualLinear weight^T * scale, tiled so column index t*C_IN + i -> channel i.
    w_lin_tiled = jnp.tile(w_mod.T * MOD_SCALE, (1, KK))        # (STYLE, KKC)
    b_lin_tiled = jnp.tile(b_mod, (KK,)).reshape(1, KKC)        # (1, KKC)
    # (C_OUT, C_IN, K, K) -> (C_OUT, KK*C_IN), flat col = (ky*K+kx)*C_IN + i.
    w2 = jnp.transpose(w_conv, (0, 2, 3, 1)).reshape(C_OUT, KKC) * CONV_SCALE
    nw = noise_w.reshape(1, 1)
    bact = b_act.reshape(C_OUT, 1)

    # --- im2col glue (one XLA fusion; data rearrangement only) ----------------
    # TODO(synk): at StyleGAN sizes form the taps in-kernel over an HW-tiled grid
    # instead of materializing the 9x-expanded cols slab in HBM.
    x_pad = jnp.pad(x, ((0, 0), (0, 0), (PAD, PAD), (PAD, PAD)))
    taps = [x_pad[:, :, ky:ky + H, kx:kx + W]
            for ky in range(K) for kx in range(K)]              # each (B,C_IN,H,W)
    cols = jnp.stack(taps, axis=1).reshape(B * KKC, HW)         # (72, 256) f32

    noise2 = noise.reshape(B, HW)

    flops = 2 * (B * C_OUT) * (B * KKC) * HW + 2 * B * STYLE * KKC
    bytes_accessed = 4 * (B * KKC * HW + B * STYLE + STYLE * KKC + KKC
                          + C_OUT * KKC + B * HW + 1 + C_OUT + B * C_OUT * HW)

    out = pl.pallas_call(
        styled_conv_kernel,
        out_shape=jax.ShapeDtypeStruct((B, C_OUT, HW), jnp.float32),
        in_specs=[
            pl.BlockSpec(memory_space=pltpu.MemorySpace.VMEM),   # cols
            pl.BlockSpec(memory_space=pltpu.MemorySpace.VMEM),   # style
            pl.BlockSpec(memory_space=pltpu.MemorySpace.VMEM),   # w_lin_tiled
            pl.BlockSpec(memory_space=pltpu.MemorySpace.VMEM),   # b_lin_tiled
            pl.BlockSpec(memory_space=pltpu.MemorySpace.VMEM),   # conv weight (flat)
            pl.BlockSpec(memory_space=pltpu.MemorySpace.VMEM),   # noise
            pl.BlockSpec(memory_space=pltpu.MemorySpace.SMEM),   # noise weight scalar
            pl.BlockSpec(memory_space=pltpu.MemorySpace.VMEM),   # activation bias
        ],
        out_specs=pl.BlockSpec(memory_space=pltpu.MemorySpace.VMEM),
        cost_estimate=pl.CostEstimate(flops=flops,
                                      transcendentals=B * C_OUT,
                                      bytes_accessed=bytes_accessed),
    )(cols, style, w_lin_tiled, b_lin_tiled, w2, noise2, nw, bact)

    return out.reshape(B, C_OUT, H, W)


def reference(x, style, noise, w_mod, b_mod, w_conv, noise_w, b_act):
    """Pure-JAX reference mirroring the fused PyTorch path (f32, HIGHEST)."""
    s = style @ w_mod.T * MOD_SCALE + b_mod[None, :]                  # (B, C_IN)
    weight = CONV_SCALE * w_conv[None] * s[:, None, :, None, None]    # (B,O,I,K,K)
    demod = jax.lax.rsqrt(jnp.sum(weight ** 2, axis=(2, 3, 4)) + EPS)
    weight = weight * demod[:, :, None, None, None]
    weight = weight.reshape(B * C_OUT, C_IN, K, K)
    x_g = x.reshape(1, B * C_IN, H, W)
    out = jax.lax.conv_general_dilated(
        x_g, weight, window_strides=(1, 1),
        padding=[(PAD, PAD), (PAD, PAD)],
        dimension_numbers=("NCHW", "OIHW", "NCHW"),
        feature_group_count=B,
        precision=jax.lax.Precision.HIGHEST)
    out = out.reshape(B, C_OUT, H, W)
    out = out + noise_w * noise
    out = out + b_act[None, :, None, None]
    return jnp.where(out >= 0, out, LRELU_SLOPE * out) * LRELU_SCALE


if __name__ == "__main__":
    key = jax.random.PRNGKey(0)
    k_x, k_style, k_noise, k_wmod, k_wconv = jax.random.split(key, 5)

    # inputs
    x = jax.random.normal(k_x, (B, C_IN, H, W), jnp.float32)
    style = jax.random.normal(k_style, (B, STYLE), jnp.float32)
    noise = jax.random.normal(k_noise, (B, 1, H, W), jnp.float32)

    # parameters (deterministic, shapes per the module __init__)
    w_mod = jax.random.normal(k_wmod, (C_IN, STYLE), jnp.float32)     # EqualLinear.weight
    b_mod = jnp.ones((C_IN,), jnp.float32)                            # bias_init=1
    w_conv = jax.random.normal(k_wconv, (C_OUT, C_IN, K, K), jnp.float32)
    noise_w = jnp.array(0.1, jnp.float32)   # NoiseInjection.weight (init 0; nonzero to exercise path)
    b_act = 0.01 * jnp.arange(C_OUT, dtype=jnp.float32)  # FusedLeakyReLU.bias (init 0; nonzero to exercise path)

    fn = jax.jit(styled_conv)
    out = fn(x, style, noise, w_mod, b_mod, w_conv, noise_w, b_act)
    out = jax.block_until_ready(out)

    ref = reference(x, style, noise, w_mod, b_mod, w_conv, noise_w, b_act)
    # f32 HIGHEST matmuls in the kernel -> tight tolerance vs f32 HIGHEST reference
    np.testing.assert_allclose(np.asarray(out), np.asarray(ref), rtol=1e-3, atol=1e-3)

    print("KERNEL_OK")
</pallas_src>

<mosaic_0001>
module attributes {stable_mosaic.version = 11 : i64} {
  func.func @styled_conv_kernel(%arg0: memref<72x256xf32, #tpu.memory_space<vmem>>, %arg1: memref<2x32xf32, #tpu.memory_space<vmem>>, %arg2: memref<32x36xf32, #tpu.memory_space<vmem>>, %arg3: memref<1x36xf32, #tpu.memory_space<vmem>>, %arg4: memref<8x36xf32, #tpu.memory_space<vmem>>, %arg5: memref<2x256xf32, #tpu.memory_space<vmem>>, %arg6: memref<1x1xf32, #tpu.memory_space<smem>>, %arg7: memref<8x1xf32, #tpu.memory_space<vmem>>, %arg8: memref<2x8x256xf32, #tpu.memory_space<vmem>>) attributes {dimension_semantics = [], scalar_prefetch = 0 : i64, scratch_operands = 0 : i64, tpu.core_type = #tpu.core_type<tc>} {
    %c0 = arith.constant 0 : index
    %c0_0 = arith.constant 0 : index
    %0 = vector.load %arg1[%c0, %c0_0] : memref<2x32xf32, #tpu.memory_space<vmem>>, vector<2x32xf32>
    %c0_1 = arith.constant 0 : index
    %c0_2 = arith.constant 0 : index
    %1 = vector.load %arg2[%c0_1, %c0_2] : memref<32x36xf32, #tpu.memory_space<vmem>>, vector<32x36xf32>
    %cst = arith.constant dense<0.000000e+00> : vector<2x36xf32>
    %2 = tpu.matmul %0, %1, %cst {dimension_numbers = #tpu.dot_dimension_numbers<[1], [0], [0], [1], [0, 0, 1, 1], [], []>, precision = #tpu.contract_precision<fp32>} : vector<2x32xf32>, vector<32x36xf32>, vector<2x36xf32> -> vector<2x36xf32>
    %c0_3 = arith.constant 0 : index
    %c0_4 = arith.constant 0 : index
    %3 = vector.load %arg3[%c0_3, %c0_4] : memref<1x36xf32, #tpu.memory_space<vmem>>, vector<1x36xf32>
    %4 = vector.broadcast %3 : vector<1x36xf32> to vector<2x36xf32>
    %5 = arith.addf %2, %4 : vector<2x36xf32>
    %c0_5 = arith.constant 0 : index
    %c0_6 = arith.constant 0 : index
    %6 = vector.load %arg4[%c0_5, %c0_6] : memref<8x36xf32, #tpu.memory_space<vmem>>, vector<8x36xf32>
    %7 = vector.shape_cast %6 : vector<8x36xf32> to vector<1x8x36xf32>
    %8 = vector.shape_cast %5 : vector<2x36xf32> to vector<2x1x36xf32>
    %9 = vector.broadcast %7 : vector<1x8x36xf32> to vector<2x8x36xf32>
    %10 = vector.broadcast %8 : vector<2x1x36xf32> to vector<2x8x36xf32>
    %11 = arith.mulf %9, %10 : vector<2x8x36xf32>
    %12 = arith.mulf %11, %11 : vector<2x8x36xf32>
    %cst_7 = arith.constant dense<0.000000e+00> : vector<2x8xf32>
    %13 = vector.multi_reduction <add>, %12, %cst_7 [2] : vector<2x8x36xf32> to vector<2x8xf32>
    %14 = vector.shape_cast %13 : vector<2x8xf32> to vector<2x8x1xf32>
    %cst_8 = arith.constant 9.99999993E-9 : f32
    %15 = vector.broadcast %cst_8 : f32 to vector<2x8x1xf32>
    %16 = arith.addf %14, %15 : vector<2x8x1xf32>
    %17 = math.rsqrt %16 : vector<2x8x1xf32>
    %18 = vector.broadcast %17 : vector<2x8x1xf32> to vector<2x8x36xf32>
    %19 = arith.mulf %11, %18 : vector<2x8x36xf32>
    %cst_9 = arith.constant 0.000000e+00 : f32
    %20 = vector.broadcast %cst_9 : f32 to vector<8x36xf32>
    %21 = vector.extract_strided_slice %19 {offsets = [0, 0, 0], sizes = [1, 8, 36], strides = [1, 1, 1]} : vector<2x8x36xf32> to vector<1x8x36xf32>
    %22 = vector.shape_cast %21 : vector<1x8x36xf32> to vector<8x36xf32>
    %23 = tpu.concatenate %22, %20 in 1 : vector<8x36xf32>, vector<8x36xf32> -> vector<8x72xf32>
    %24 = vector.extract_strided_slice %19 {offsets = [1, 0, 0], sizes = [1, 8, 36], strides = [1, 1, 1]} : vector<2x8x36xf32> to vector<1x8x36xf32>
    %25 = vector.shape_cast %24 : vector<1x8x36xf32> to vector<8x36xf32>
    %26 = tpu.concatenate %20, %25 in 1 : vector<8x36xf32>, vector<8x36xf32> -> vector<8x72xf32>
    %27 = tpu.concatenate %23, %26 in 0 : vector<8x72xf32>, vector<8x72xf32> -> vector<16x72xf32>
    %c0_10 = arith.constant 0 : index
    %c0_11 = arith.constant 0 : index
    %28 = vector.load %arg0[%c0_10, %c0_11] : memref<72x256xf32, #tpu.memory_space<vmem>>, vector<72x256xf32>
    %cst_12 = arith.constant dense<0.000000e+00> : vector<16x256xf32>
    %29 = tpu.matmul %27, %28, %cst_12 {dimension_numbers = #tpu.dot_dimension_numbers<[1], [0], [0], [1], [0, 0, 1, 1], [], []>, precision = #tpu.contract_precision<fp32>} : vector<16x72xf32>, vector<72x256xf32>, vector<16x256xf32> -> vector<16x256xf32>
    %c0_13 = arith.constant 0 : index
    %c0_14 = arith.constant 0 : index
    %30 = memref.load %arg6[%c0_13, %c0_14] : memref<1x1xf32, #tpu.memory_space<smem>>
    %c0_15 = arith.constant 0 : index
    %c0_16 = arith.constant 0 : index
    %31 = vector.load %arg5[%c0_15, %c0_16] : memref<2x256xf32, #tpu.memory_space<vmem>>, vector<2x256xf32>
    %32 = vector.broadcast %30 : f32 to vector<2x256xf32>
    %33 = arith.mulf %32, %31 : vector<2x256xf32>
    %c0_17 = arith.constant 0 : index
    %c0_18 = arith.constant 0 : index
    %34 = vector.load %arg7[%c0_17, %c0_18] : memref<8x1xf32, #tpu.memory_space<vmem>>, vector<8x1xf32>
    %35 = vector.extract_strided_slice %29 {offsets = [0, 0], sizes = [8, 256], strides = [1, 1]} : vector<16x256xf32> to vector<8x256xf32>
    %36 = vector.extract_strided_slice %33 {offsets = [0, 0], sizes = [1, 256], strides = [1, 1]} : vector<2x256xf32> to vector<1x256xf32>
    %37 = vector.broadcast %36 : vector<1x256xf32> to vector<8x256xf32>
    %38 = arith.addf %35, %37 : vector<8x256xf32>
    %39 = vector.broadcast %34 : vector<8x1xf32> to vector<8x256xf32>
    %40 = arith.addf %38, %39 : vector<8x256xf32>
    %cst_19 = arith.constant 2.000000e-01 : f32
    %41 = vector.broadcast %cst_19 : f32 to vector<8x256xf32>
    %42 = arith.mulf %41, %40 : vector<8x256xf32>
    %43 = arith.maximumf %40, %42 : vector<8x256xf32>
    %cst_20 = arith.constant 1.41421354 : f32
    %44 = vector.broadcast %cst_20 : f32 to vector<8x256xf32>
    %45 = arith.mulf %43, %44 : vector<8x256xf32>
    %c0_21 = arith.constant 0 : index
    %c0_22 = arith.constant 0 : index
    %c0_23 = arith.constant 0 : index
    %46 = vector.load %arg8[%c0_21, %c0_22, %c0_23] : memref<2x8x256xf32, #tpu.memory_space<vmem>>, vector<1x8x256xf32>
    %47 = vector.shape_cast %46 : vector<1x8x256xf32> to vector<8x256xf32>
    %48 = vector.shape_cast %45 : vector<8x256xf32> to vector<1x8x256xf32>
    tpu.vector_store %arg8[%c0_21, %c0_22, %c0_23], %48 {strides = array<i32>} : memref<2x8x256xf32, #tpu.memory_space<vmem>>, vector<1x8x256xf32>,
    %49 = vector.extract_strided_slice %29 {offsets = [8, 0], sizes = [8, 256], strides = [1, 1]} : vector<16x256xf32> to vector<8x256xf32>
    %50 = vector.extract_strided_slice %33 {offsets = [1, 0], sizes = [1, 256], strides = [1, 1]} : vector<2x256xf32> to vector<1x256xf32>
    %51 = vector.broadcast %50 : vector<1x256xf32> to vector<8x256xf32>
    %52 = arith.addf %49, %51 : vector<8x256xf32>
    %53 = vector.broadcast %34 : vector<8x1xf32> to vector<8x256xf32>
    %54 = arith.addf %52, %53 : vector<8x256xf32>
    %cst_24 = arith.constant 2.000000e-01 : f32
    %55 = vector.broadcast %cst_24 : f32 to vector<8x256xf32>
    %56 = arith.mulf %55, %54 : vector<8x256xf32>
    %57 = arith.maximumf %54, %56 : vector<8x256xf32>
    %cst_25 = arith.constant 1.41421354 : f32
    %58 = vector.broadcast %cst_25 : f32 to vector<8x256xf32>
    %59 = arith.mulf %57, %58 : vector<8x256xf32>
    %c1 = arith.constant 1 : index
    %c0_26 = arith.constant 0 : index
    %c0_27 = arith.constant 0 : index
    %60 = vector.load %arg8[%c1, %c0_26, %c0_27] : memref<2x8x256xf32, #tpu.memory_space<vmem>>, vector<1x8x256xf32>
    %61 = vector.shape_cast %60 : vector<1x8x256xf32> to vector<8x256xf32>
    %62 = vector.shape_cast %59 : vector<8x256xf32> to vector<1x8x256xf32>
    tpu.vector_store %arg8[%c1, %c0_26, %c0_27], %62 {strides = array<i32>} : memref<2x8x256xf32, #tpu.memory_space<vmem>>, vector<1x8x256xf32>,
    return
  }
}

</mosaic_0001>

<bundles_post_ra>
// kernel: tile.14
= control target key start
LH: loop header
LB: loop body
LE: loop exit
PB: predicated region body
PF: predicated region fallthrough
CT: control target
= control target key end

     0   :  { %vm46_vm0 = vcmask 261120   ;;  %s184_s0 = inlined_call_operand.vmem [shape: f32[32,9,4], index: 0, kind: input, shape index: {}]   ;;  %s185_s1 = inlined_call_operand.vmem [shape: f32[32,36], index: 1, kind: output, shape index: {}]  }
   0x1   :  { %v95_v0 = vld [vmem:[%s184_s0 + $0x20] sm:$0xf]  ;;  %v96_v1 = vld [vmem:[%s184_s0 + $0x1c] sm:$0xf]  ;;  %v97_v2 = vld [vmem:[%s184_s0 + $0x18] sm:$0xf] }
   0x2   :  { %8 = vst [vmem:[#allocation0 + $0x40] sm:$0xf] %v95_v0  ;;  %13 = vst [vmem:[#allocation0 + $0x38] sm:$0xf] %v96_v1  ;;  %v98_v3 = vld [vmem:[%s184_s0 + $0x14] sm:$0xf] }
   0x3   :  { %18 = vst [vmem:[#allocation0 + $0x30] sm:$0xf] %v97_v2  ;;  %v99_v4 = vld [vmem:[%s184_s0 + $0x10] sm:$0xf]  ;;  %v100_v5 = vld [vmem:[%s184_s0 + $0xc] sm:$0xf] }
   0x4   :  { %23 = vst [vmem:[#allocation0 + $0x28] sm:$0xf] %v98_v3  ;;  %28 = vst [vmem:[#allocation0 + $0x20] sm:$0xf] %v99_v4  ;;  %v101_v6 = vld [vmem:[%s184_s0 + $0x8] sm:$0xf] }
   0x5   :  { %33 = vst [vmem:[#allocation0 + $0x18] sm:$0xf] %v100_v5  ;;  %v102_v7 = vld [vmem:[%s184_s0 + $0x4] sm:$0xf]  ;;  %v43_v8 = vld [vmem:[%s184_s0] sm:$0xf] }
   0x6   :  { %38 = vst [vmem:[#allocation0 + $0x10] sm:$0xf] %v101_v6  ;;  %42 = vst [vmem:[#allocation0 + $0x8] sm:$0xf] %v102_v7 }
   0x7   :  { %44 = vst [vmem:[#allocation0] sm:$0xf] %v43_v8 }
   0x9   :  { %v79_v10 = vld [vmem:[#allocation0 + $0x38] sm:$0xf]   ;;  %v84_v11 = vld [vmem:[#allocation0 + $0x40] sm:$0xf]  }
   0xa   :  { %v74_v9 = vld [vmem:[#allocation0 + $0x30] sm:$0xf]   ;;  %109 = vst.msk [vmem:[%s185_s1 + $0x1c] sm:$0xf] %vm46_vm0, %v79_v10   ;;  %110 = vst.msk [vmem:[%s185_s1 + $0x20] sm:$0xf] %vm46_vm0, %v84_v11  }
   0xb   :  { %v64_v13 = vld [vmem:[#allocation0 + $0x20] sm:$0xf]   ;;  %v69_v14 = vld [vmem:[#allocation0 + $0x28] sm:$0xf]   ;;  %108 = vst.msk [vmem:[%s185_s1 + $0x18] sm:$0xf] %vm46_vm0, %v74_v9  }
   0xc   :  { %v59_v12 = vld [vmem:[#allocation0 + $0x18] sm:$0xf]   ;;  %106 = vst.msk [vmem:[%s185_s1 + $0x10] sm:$0xf] %vm46_vm0, %v64_v13   ;;  %107 = vst.msk [vmem:[%s185_s1 + $0x14] sm:$0xf] %vm46_vm0, %v69_v14  }
   0xd   :  { %v49_v16 = vld [vmem:[#allocation0 + $0x8] sm:$0xf]   ;;  %v54_v17 = vld [vmem:[#allocation0 + $0x10] sm:$0xf]   ;;  %105 = vst.msk [vmem:[%s185_s1 + $0xc] sm:$0xf] %vm46_vm0, %v59_v12  }
   0xe   :  { %v45_v15 = vld [vmem:[#allocation0] sm:$0xf]   ;;  %103 = vst.msk [vmem:[%s185_s1 + $0x4] sm:$0xf] %vm46_vm0, %v49_v16   ;;  %104 = vst.msk [vmem:[%s185_s1 + $0x8] sm:$0xf] %vm46_vm0, %v54_v17  }
   0xf   :  { %47 = vst.msk [vmem:[%s185_s1] sm:$0xf] %vm46_vm0, %v45_v15  }

// kernel: tile.18
= control target key start
LH: loop header
LB: loop body
LE: loop exit
PB: predicated region body
PF: predicated region fallthrough
CT: control target
= control target key end

     0   :  { %s28_s0 = inlined_call_operand.vmem [shape: f32[4], index: 0, kind: input, shape index: {}]   ;;  %s29_s1 = inlined_call_operand.vmem [shape: f32[9,4], index: 1, kind: output, shape index: {}]  }
   0x1   :  { %v4_v0 = vld [vmem:[%s28_s0] ss:$0 sm:$0xff] }
   0x2   :  { %5 = vst [vmem:[%s29_s1] sm:$0xff] %v4_v0  ;;  %8 = vst [vmem:[%s29_s1 + $0x8] sm:$0xff] %v4_v0 }

// kernel: tile.19
= control target key start
LH: loop header
LB: loop body
LE: loop exit
PB: predicated region body
PF: predicated region fallthrough
CT: control target
= control target key end

     0   :  { %s75_s10 = smov 32   ;;  %s76_s11 = smov 24   ;;  %vm3_vm0 = vcmask 31744   ;;  %vm9_vm1 = vcmask 294144   ;;  %vm15_vm2 = vcmask 261344   ;;  %vm21_vm3 = vcmask 228544   ;;  %s123_s0 = inlined_call_operand.vmem [shape: f32[9,4], index: 0, kind: input, shape index: {}]   ;;  %s124_s1 = inlined_call_operand.vmem [shape: f32[1,36], index: 1, kind: output, shape index: {}]  }
   0x1   :  { %v59_v0 = vld [vmem:[%s123_s0 + $0x8] sm:$0x1]   ;;  %v61_v1 = vld [vmem:[%s123_s0 + $0x6] sm:$0x1]   ;;  %v60_v2 = vld [vmem:[%s123_s0 + $0x7] sm:$0x1]  }
   0x2   :  { %7 = vrot.lane.b32.xlu0 %v59_v0, %s75_s10  ;;  %19 = vrot.lane.b32.xlu1 %v61_v1, %s76_s11  ;;  %v62_v3 = vld [vmem:[%s123_s0 + $0x5] sm:$0x1]   ;;  %v2_v4 = vld [vmem:[%s123_s0] sm:$0x1]   ;;  %s77_s18 = smov 28   ;;  %s78_s19 = smov 20  }
   0x3   :  { %4 = vst.msk [vmem:[#allocation0] sm:$0x1] %vm3_vm0, %v2_v4   ;;  %v63_v5 = vld [vmem:[%s123_s0 + $0x4] sm:$0x1]   ;;  %v64_v6 = vld [vmem:[%s123_s0 + $0x3] sm:$0x1]  }
   0x4   :  { %s79_s24 = smov 16   ;;  %s80_s25 = smov 12   ;;  %v65_v7 = vld [vmem:[%s123_s0 + $0x2] sm:$0x1]   ;;  %v66_v8 = vld [vmem:[%s123_s0 + $0x1] sm:$0x1]  }
   0x5   :  { %s81_s0 = smov 8   ;;  %s82_s30 = smov 4   ;;  %vm27_vm4 = vcmask 195744   ;;  %vm33_vm5 = vcmask 162944   ;;  %vm39_vm6 = vcmask 130144   ;;  %vm45_vm7 = vcmask 97344  }
   0x6   :  { %13 = vrot.lane.b32.xlu0 %v60_v2, %s77_s18  ;;  %25 = vrot.lane.b32.xlu1 %v62_v3, %s78_s19  ;;  %vm51_vm8 = vcmask 64544  }
   0xa   :  { %31 = vrot.lane.b32.xlu0 %v63_v5, %s79_s24  ;;  %37 = vrot.lane.b32.xlu1 %v64_v6, %s80_s25 }
   0xe   :  { %43 = vrot.lane.b32.xlu0 %v65_v7, %s81_s0  ;;  %49 = vrot.lane.b32.xlu1 %v66_v8, %s82_s30 }
  0x74   :  { %v8_v9 = vpop.permute.xlu0 %7   ;;  %v20_v10 = vpop.permute.xlu1 %19  }
  0x75   :  { %10 = vst.msk [vmem:[#allocation0] sm:$0x1] %vm9_vm1, %v8_v9  }
  0x78   :  { %v14_v11 = vpop.permute.xlu0 %13   ;;  %v26_v12 = vpop.permute.xlu1 %25  }
  0x79   :  { %16 = vst.msk [vmem:[#allocation0] sm:$0x1] %vm15_vm2, %v14_v11  }
  0x7a   :  { %22 = vst.msk [vmem:[#allocation0] sm:$0x1] %vm21_vm3, %v20_v10  }
  0x7b   :  { %28 = vst.msk [vmem:[#allocation0] sm:$0x1] %vm27_vm4, %v26_v12  }
  0x7c   :  { %v32_v13 = vpop.permute.xlu0 %31   ;;  %v38_v14 = vpop.permute.xlu1 %37  }
  0x7d   :  { %34 = vst.msk [vmem:[#allocation0] sm:$0x1] %vm33_vm5, %v32_v13  }
  0x7e   :  { %40 = vst.msk [vmem:[#allocation0] sm:$0x1] %vm39_vm6, %v38_v14  }
  0x80   :  { %v44_v15 = vpop.permute.xlu0 %43   ;;  %v50_v16 = vpop.permute.xlu1 %49  }
  0x81   :  { %46 = vst.msk [vmem:[#allocation0] sm:$0x1] %vm45_vm7, %v44_v15  }
  0x82   :  { %52 = vst.msk [vmem:[#allocation0] sm:$0x1] %vm51_vm8, %v50_v16  }
  0x89   :  { %v56_v17 = vld [vmem:[#allocation0] sm:$0x1] }
  0x8a   :  { %58 = vst [vmem:[%s124_s1] sm:$0x1] %v56_v17 }

// kernel: styled_conv.1
= control target key start
LH: loop header
LB: loop body
LE: loop exit
PB: predicated region body
PF: predicated region fallthrough
CT: control target
= control target key end

     0   :  { %vm42_vm0 = vcmask 261120   ;;  %v1684_v0 = vmov 0.0|0.0   ;;  %vm1685_vm1 = vmmov 0   ;;  %v1686_v4 = vmov 0.0   ;;  %s2084_s2 = inlined_call_operand.vmem [shape: f32[32,36], index: 2, kind: input, shape index: {}]   ;;  %s2085_s1 = inlined_call_operand.vmem [shape: f32[2,32], index: 1, kind: input, shape index: {}]   ;;  %s2086_s3 = inlined_call_operand.vmem [shape: f32[1,36], index: 3, kind: input, shape index: {}]   ;;  %s2087_s4 = inlined_call_operand.vmem [shape: f32[8,36], index: 4, kind: input, shape index: {}]   ;;  %s2088_s0 = inlined_call_operand.vmem [shape: f32[72,256], index: 0, kind: input, shape index: {}]   ;;  %s2089_s7 = inlined_call_operand.vmem [shape: f32[8,1], index: 7, kind: input, shape index: {}]   ;;  %s2090_s5 = inlined_call_operand.vmem [shape: f32[2,256], index: 5, kind: input, shape index: {}]   ;;  %s2091_s6 = inlined_call_operand.<no memory space> [shape: f32[1,1], index: 6, kind: input, shape index: {}]   ;;  %s2092_s8 = inlined_call_operand.vmem [shape: f32[2,8,256], index: 8, kind: output, shape index: {}]  }
   0x1   :  { %1516 = vmatprep.subr.bf16.mxu0 %v1684_v0  ;;  %v31_v1 = vld [vmem:[%s2084_s2] sm:$0xff]  ;;  %v32_v2 = vld [vmem:[%s2084_s2 + $0x8] sm:$0xff]  ;;  %v33_v3 = vld [vmem:[%s2084_s2 + $0x10] sm:$0xff]  ;;  %1463 = vmatprep.mubr.msk.f32.mxu0 %vm1685_vm1, %v1686_v4  ;;  %v1687_v43 = vmov 1966171168   ;;  %v536_v45 = vlaneseq  ;;  %vm569_vm2 = vcmask 293888  }
   0x2   :  { %v47_v5 = vand.u32 4294901760, %v31_v1  ;;  %v50_v6 = vand.u32 4294901760, %v32_v2  ;;  %v34_v7 = vld [vmem:[%s2084_s2 + $0x18] sm:$0xff]  ;;  %v53_v8 = vand.u32 4294901760, %v33_v3  ;;  %v30_v9 = vld [vmem:[%s2085_s1] sm:$0x3]  ;;  %1510 = vmatprep.subr.bf16.mxu1 %v1684_v0  ;;  %1452 = vmatprep.mubr.msk.f32.mxu1 %vm1685_vm1, %v1686_v4  ;;  %v534_v44 = vunpack.c.l.s4 %v1687_v43 }
   0x3   :  { %v56_v10 = vand.u32 4294901760, %v34_v7  ;;  %v44_v11 = vsel %vm42_vm0, %v30_v9, 0  ;;  %v1411_v46 = vld [vmem:[%s2086_s3] ss:$0 sm:$0xff]  ;;  %v1780_v48 = vshrl.u32 %v536_v45, 7  ;;  %vm606_vm3 = vcmask 588800  }
   0x4   :  { %v127_v12 = vsub.f32 %v31_v1, %v47_v5  ;;  %v134_v13 = vsub.f32 %v32_v2, %v50_v6  ;;  %v141_v14 = vsub.f32 %v33_v3, %v53_v8  ;;  %v115_v16 = vand.u32 4294901760, %v44_v11  ;;  %v531_v60 = vld [vmem:[%s2087_s4] sm:$0xff] }
   0x5   :  { %v148_v15 = vsub.f32 %v34_v7, %v56_v10  ;;  %v1511_v17 = vpack.c.bf16 %v50_v6, %v47_v5  ;;  %v1514_v27 = vpack.c.bf16 %v56_v10, %v53_v8  ;;  %v535_v47 = vunpack.c.0.s8 %v534_v44  ;;  %v589_v5 = vld [vmem:[%s2088_s0 + $0x8] sm:$0xff]  ;;  %v591_v6 = vld [vmem:[%s2088_s0 + $0x18] sm:$0xff]  ;;  %v588_v9 = vld [vmem:[%s2088_s0] sm:$0xff] }
   0x6   :  { %v128_v18 = vand.u32 4294901760, %v127_v12  ;;  %v135_v19 = vand.u32 4294901760, %v134_v13  ;;  %v142_v20 = vand.u32 4294901760, %v141_v14  ;;  %v116_v22 = vsub.f32 %v44_v11, %v115_v16  ;;  %v590_v10 = vld [vmem:[%s2088_s0 + $0x10] sm:$0xff] }
   0x7   :  { %v149_v21 = vand.u32 4294901760, %v148_v15  ;;  %1512 = vmatpush3.bf16.msra.mxu1 %v1511_v17  ;;  %v1523_v37 = vpack.c.bf16 %v134_v13, %v127_v12  ;;  %v1526_v38 = vpack.c.bf16 %v148_v15, %v141_v14  ;;  %v538_v50 = vsub.s32 %v535_v47, %v1780_v48  ;;  %v601_v47 = vld [vmem:[%s2088_s0 + $0x68] sm:$0xff] }
   0x8   :  { %v129_v23 = vsub.f32 %v127_v12, %v128_v18  ;;  %v136_v24 = vsub.f32 %v134_v13, %v135_v19  ;;  %v143_v25 = vsub.f32 %v141_v14, %v142_v20  ;;  %1513 = vmatprep.subr.bf16.mxu1 %v1684_v0  ;;  %v117_v28 = vand.u32 4294901760, %v116_v22 }
   0x9   :  { %v150_v26 = vsub.f32 %v148_v15, %v149_v21  ;;  %v1535_v39 = vpack.c.bf16 %v135_v19, %v128_v18  ;;  %v1538_v40 = vpack.c.bf16 %v149_v21, %v142_v20  ;;  %v1784_v55 = vsub.s32 0, %v1780_v48  ;;  %v595_v18 = vld [vmem:[%s2088_s0 + $0x38] sm:$0xff] }
   0xa   :  { %v130_v29 = vand.u32 4294901760, %v129_v23  ;;  %v137_v30 = vand.u32 4294901760, %v136_v24  ;;  %v144_v31 = vand.u32 4294901760, %v143_v25  ;;  %v118_v33 = vsub.f32 %v116_v22, %v117_v28  ;;  %v594_v23 = vld [vmem:[%s2088_s0 + $0x30] sm:$0xff] }
   0xb   :  { %v151_v32 = vand.u32 4294901760, %v150_v26  ;;  %1515 = vmatpush3.bf16.msra.mxu1 %v1514_v27  ;;  %v613_v7 = vand.u32 4294901760, %v589_v5  ;;  %v617_v8 = vand.u32 4294901760, %v591_v6  ;;  %v615_v11 = vand.u32 4294901760, %v588_v9 }
   0xc   :  { %v1517_v34 = vpack.c.bf16 %v137_v30, %v130_v29  ;;  %v119_v35 = vand.u32 4294901760, %v118_v33  ;;  %v619_v12 = vand.u32 4294901760, %v590_v10  ;;  %v625_v21 = vand.u32 4294901760, %v595_v18 }
   0xd   :  { %v1520_v36 = vpack.c.bf16 %v151_v32, %v144_v31  ;;  %v1813_v13 = vsub.f32 %v589_v5, %v613_v7  ;;  %v1815_v14 = vsub.f32 %v591_v6, %v617_v8  ;;  %v1817_v15 = vsub.f32 %v588_v9, %v615_v11  ;;  %v597_v31 = vld [vmem:[%s2088_s0 + $0x48] sm:$0xff]  ;;  %v599_v32 = vld [vmem:[%s2088_s0 + $0x58] sm:$0xff] }
   0xe   :  { %1518 = vmatpush3.bf16.msra.mxu0 %v1517_v34  ;;  %1453 = vmatmul.mubr.f32.vlgmr.msra.gmra.mrb[0].mxu1 %v119_v35  ;;  %v627_v26 = vand.u32 4294901760, %v594_v23  ;;  %v629_v34 = vand.u32 4294901760, %v597_v31  ;;  %v633_v35 = vand.u32 4294901760, %v599_v32  ;;  %v1867_v44 = vpack.c.bf16 %v619_v12, %v615_v11  ;;  %v605_v6 = vld [vmem:[%s2088_s0 + $0x88] sm:$0xff] }
   0xf   :  { %1519 = vmatprep.subr.bf16.mxu0 %v1684_v0  ;;  %987 = vmatprep.mubr.f32.mxu1 %v1686_v4  ;;  %v1578_v19 = vpack.c.bf16 %v1815_v14, %v1813_v13 }
  0x10   :  { %v1843_v30 = vsub.f32 %v594_v23, %v627_v26  ;;  %v1865_v43 = vsub.f32 %v599_v32, %v633_v35  ;;  %v1906_v5 = vpack.c.bf16 %v633_v35, %v629_v34  ;;  %v726_v35 = vand.u32 4294901760, %v1817_v15 }
  0x11   :  { %1579 = vmatprep.subr.bf16.mxu1 %v1578_v19 }
  0x12   :  { %1521 = vmatpush3.bf16.msra.mxu0 %v1520_v36  ;;  %v596_v36 = vld [vmem:[%s2088_s0 + $0x40] sm:$0xff] }
  0x13   :  { %1522 = vmatprep.subr.bf16.mxu0 %v1684_v0 }
  0x15   :  { %1464 = vmatmul.mubr.f32.vlgmr.msra.gmra.mrb[0].mxu0 %v115_v16 }
  0x16   :  { %1524 = vmatpush3.bf16.msra.mxu0 %v1523_v37  ;;  %1474 = vmatprep.mubr.msk.f32.mxu0 %vm1685_vm1, %v1686_v4  ;;  %v598_v37 = vld [vmem:[%s2088_s0 + $0x50] sm:$0xff] }
  0x17   :  { %1525 = vmatprep.subr.bf16.mxu0 %v1684_v0 }
  0x1a   :  { %1527 = vmatpush3.bf16.msra.mxu0 %v1526_v38 }
  0x1b   :  { %1528 = vmatprep.subr.bf16.mxu0 %v1684_v0 }
  0x1d   :  { %1475 = vmatmul.mubr.f32.vlgmr.msra.gmra.mrb[0].mxu0 %v116_v22  ;;  %v592_v22 = vld [vmem:[%s2088_s0 + $0x20] sm:$0xff] }
  0x1e   :  { %1530 = vmatpush3.bf16.msra.mxu0 %v1511_v17  ;;  %1485 = vmatprep.mubr.msk.f32.mxu0 %vm1685_vm1, %v1686_v4  ;;  %v623_v25 = vand.u32 4294901760, %v592_v22 }
  0x1f   :  { %1531 = vmatprep.subr.bf16.mxu0 %v1684_v0 }
  0x20   :  { %v1841_v29 = vsub.f32 %v592_v22, %v623_v25 }
  0x22   :  { %1533 = vmatpush3.bf16.msra.mxu0 %v1514_v27  ;;  %v1584_v38 = vpack.c.bf16 %v1843_v30, %v1841_v29 }
  0x23   :  { %1534 = vmatprep.subr.bf16.mxu0 %v1684_v0 }
  0x25   :  { %1486 = vmatmul.mubr.f32.vlgmr.msra.gmra.mrb[0].mxu0 %v117_v28  ;;  %v1839_v28 = vsub.f32 %v595_v18, %v625_v21 }
  0x26   :  { %1536 = vmatpush3.bf16.msra.mxu0 %v1535_v39  ;;  %1496 = vmatprep.mubr.msk.f32.mxu0 %vm1685_vm1, %v1686_v4  ;;  %v631_v39 = vand.u32 4294901760, %v596_v36 }
  0x27   :  { %1537 = vmatprep.subr.bf16.mxu0 %v1684_v0 }
  0x28   :  { %v1869_v45 = vsub.f32 %v596_v36, %v631_v39 }
  0x2a   :  { %1539 = vmatpush3.bf16.msra.mxu0 %v1538_v40  ;;  %v635_v40 = vand.u32 4294901760, %v598_v37 }
  0x2b   :  { %1540 = vmatprep.subr.bf16.mxu0 %v1684_v0 }
  0x2c   :  { %v1917_v9 = vpack.c.bf16 %v635_v40, %v631_v39 }
  0x2d   :  { %1497 = vmatmul.mubr.f32.vlgmr.msra.gmra.mrb[0].mxu0 %v115_v16 }
  0x2e   :  { %1542 = vmatpush3.bf16.msra.mxu0 %v1511_v17  ;;  %1507 = vmatprep.mubr.msk.f32.mxu0 %vm1685_vm1, %v1686_v4  ;;  %v593_v17 = vld [vmem:[%s2088_s0 + $0x28] sm:$0xff] }
  0x2f   :  { %1543 = vmatprep.subr.bf16.mxu0 %v1684_v0  ;;  %v621_v20 = vand.u32 4294901760, %v593_v17 }
  0x32   :  { %1545 = vmatpush3.bf16.msra.mxu0 %v1514_v27  ;;  %v1837_v27 = vsub.f32 %v593_v17, %v621_v20 }
  0x34   :  { %v1582_v33 = vpack.c.bf16 %v1839_v28, %v1837_v27  ;;  %v744_v39 = vand.u32 4294901760, %v1837_v27 }
  0x35   :  { %1508 = vmatmul.mubr.f32.vlgmr.msra.gmra.mrb[0].mxu0 %v115_v16  ;;  %v1819_v16 = vsub.f32 %v590_v10, %v619_v12  ;;  %v1919_v10 = vand.u32 4294901760, %v605_v6 }
  0x36   :  { %695 = vmatprep.mubr.f32.mxu0 %v1686_v4 }
  0x37   :  { %v1580_v24 = vpack.c.bf16 %v1819_v16, %v1817_v15  ;;  %v1927_v17 = vsub.f32 %v605_v6, %v1919_v10  ;;  %v738_v36 = vand.u32 4294901760, %v1819_v16 }
  0x39   :  { %1581 = vmatpush1.bf16.msra.mxu1 %v1580_v24  ;;  %v739_v6 = vsub.f32 %v1819_v16, %v738_v36 }
  0x3a   :  { %1583 = vmatprep.subr.bf16.mxu1 %v1582_v33 }
  0x3d   :  { %1585 = vmatpush1.bf16.msra.mxu1 %v1584_v38 }
  0xe1   :  { %v121_v41 = vpop.f32.mrb[0].mxu1 }
  0xe2   :  { %v1454_v42 = vpop.f32.mrb[1].mxu1  ;;  %v122_v49 = vadd.f32 %v1411_v46, %v121_v41  ;;  %v1861_v41 = vpack.c.bf16 %v617_v8, %v613_v7  ;;  %v1871_v46 = vsub.f32 %v598_v37, %v635_v40  ;;  %v604_v7 = vld [vmem:[%s2088_s0 + $0x80] sm:$0xff]  ;;  %v1952_v37 = vpack.c.bf16 %v738_v36, %v726_v35 }
  0xe3   :  { %v1863_v42 = vsub.f32 %v597_v31, %v629_v34  ;;  %v1921_v11 = vand.u32 4294901760, %v604_v7  ;;  %v756_v40 = vand.u32 4294901760, %v1839_v28 }
  0xe4   :  { %1547 = vmatprep.subr.bf16.mxu0 %v1861_v41 }
  0xe5   :  { %1549 = vmatpush1.bf16.msra.mxu0 %v1867_v44  ;;  %v1930_v18 = vsub.f32 %v604_v7, %v1921_v11 }
 0x108   :  { %v527_v51 = vpop.f32.mrb[0].mxu0 }
 0x109   :  { %v1643_v52 = vadd.f32 %v527_v51, %v122_v49  ;;  %v1509_v53 = vpop.f32.mrb[1].mxu0  ;;  %v603_v49 = vld [vmem:[%s2088_s0 + $0x78] sm:$0xff]  ;;  %v637_v51 = vand.u32 4294901760, %v601_v47 }
 0x10a   :  { %v600_v53 = vld [vmem:[%s2088_s0 + $0x60] sm:$0xff] }
 0x10b   :  { %v539_v54 = vrot.slane %v1643_v52, %v538_v50  ;;  %v641_v52 = vand.u32 4294901760, %v603_v49 }
 0x10d   :  { %v540_v56 = vcombine.high %v539_v54, %v539_v54  ;;  %v547_v57 = vrot.slane %v539_v54, %v538_v50  ;;  %v602_v54 = vld [vmem:[%s2088_s0 + $0x70] sm:$0xff]  ;;  %v1924_v12 = vpack.c.bf16 %v641_v52, %v637_v51  ;;  %s1688_s0 = smov 36  }
 0x10f   :  { %v554_v58 = vrot.slane %v540_v56, %v538_v50  ;;  %v558_v59 = vrot.slane %v547_v57, %v1784_v55  ;;  %v1586_v50 = vpack.c.bf16 %v1865_v43, %v1863_v42  ;;  %v1588_v56 = vpack.c.bf16 %v1871_v46, %v1869_v45 }
 0x110   :  { %v639_v57 = vand.u32 4294901760, %v600_v53 }
 0x111   :  { %v562_v61 = vrot.slane %v554_v58, %v1784_v55  ;;  %v1793_v63 = vmul.f32 %v558_v59, %v531_v60  ;;  %v643_v58 = vand.u32 4294901760, %v602_v54  ;;  %1587 = vmatprep.subr.bf16.mxu1 %v1586_v50  ;;  %v1891_v59 = vpack.c.bf16 %v625_v21, %v621_v20 }
 0x112   :  { %1589 = vmatpush1.bf16.msra.mxu1 %v1588_v56  ;;  %v720_v20 = vand.u32 4294901760, %v1813_v13  ;;  %v732_v21 = vand.u32 4294901760, %v1815_v14  ;;  %v762_v50 = vand.u32 4294901760, %v1843_v30  ;;  %v780_v56 = vand.u32 4294901760, %v1865_v43 }
 0x113   :  { %v1791_v62 = vmul.f32 %v562_v61, %v531_v60  ;;  %v567_v2 = vmul.f32 %v1793_v63, %v1793_v63  ;;  %v1893_v60 = vsub.f32 %v601_v47, %v637_v51  ;;  %v1895_v61 = vsub.f32 %v603_v49, %v641_v52  ;;  %1551 = vmatprep.subr.bf16.mxu0 %v1891_v59 }
 0x114   :  { %v1936_v19 = vpack.c.bf16 %v643_v58, %v639_v57  ;;  %v721_v22 = vsub.f32 %v1813_v13, %v720_v20  ;;  %v733_v23 = vsub.f32 %v1815_v14, %v732_v21  ;;  %v750_v49 = vand.u32 4294901760, %v1841_v29  ;;  %v1339_v13 = vld [vmem:[%s2089_s7] sm:$0xff] }
 0x115   :  { %v568_v0 = vmul.f32 %v1791_v62, %v1791_v62  ;;  %v570_v3 = vsel %vm569_vm2, %v567_v2, 0.0  ;;  %v1901_v2 = vsub.f32 %v602_v54, %v643_v58  ;;  %v1959_v51 = vpack.c.bf16 %v756_v40, %v744_v39 }
 0x116   :  { %v722_v24 = vand.u32 4294901760, %v721_v22  ;;  %v1961_v52 = vpack.c.bf16 %v762_v50, %v750_v49  ;;  %v768_v54 = vand.u32 4294901760, %v1863_v42  ;;  %v786_v58 = vand.u32 4294901760, %v1871_v46 }
 0x117   :  { %v573_v1 = vsel %vm569_vm2, %v568_v0, 0.0  ;;  %v1897_v0 = vpack.c.bf16 %v627_v26, %v623_v25  ;;  %v734_v25 = vand.u32 4294901760, %v733_v23  ;;  %v745_v23 = vsub.f32 %v1837_v27, %v744_v39 }
 0x118   :  { %574 = vadd.xlane.f32.xlu0 %v573_v1  ;;  %v1899_v1 = vsub.f32 %v600_v53, %v639_v57  ;;  %v774_v57 = vand.u32 4294901760, %v1869_v45  ;;  %v1970_v7 = vpack.c.bf16 %v780_v56, %v768_v54  ;;  %v810_v16 = vand.u32 4294901760, %v1901_v2 }
 0x119   :  { %1553 = vmatpush1.bf16.msra.mxu0 %v1897_v0  ;;  %v1562_v26 = vpack.c.bf16 %v734_v25, %v722_v24  ;;  %v757_v24 = vsub.f32 %v1839_v28, %v756_v40  ;;  %v792_v25 = vand.u32 4294901760, %v1893_v60  ;;  %v740_v28 = vand.u32 4294901760, %v739_v6 }
 0x11a   :  { %v1592_v8 = vpack.c.bf16 %v1901_v2, %v1899_v1  ;;  %1555 = vmatprep.subr.bf16.mxu0 %v1906_v5  ;;  %v763_v36 = vsub.f32 %v1843_v30, %v762_v50  ;;  %v769_v40 = vsub.f32 %v1863_v42, %v768_v54 }
 0x11b   :  { %v758_v39 = vand.u32 4294901760, %v757_v24  ;;  %v793_v6 = vsub.f32 %v1893_v60, %v792_v25 }
 0x11c   :  { %571 = vadd.xlane.f32.xlu0 %v570_v3  ;;  %v1590_v3 = vpack.c.bf16 %v1895_v61, %v1893_v60  ;;  %v764_v50 = vand.u32 4294901760, %v763_v36  ;;  %v770_v54 = vand.u32 4294901760, %v769_v40 }
 0x11d   :  { %1557 = vmatpush1.bf16.msra.mxu0 %v1917_v9  ;;  %v794_v60 = vand.u32 4294901760, %v793_v6 }
 0x11e   :  { %1591 = vmatprep.subr.bf16.mxu1 %v1590_v3  ;;  %1559 = vmatprep.subr.bf16.mxu0 %v1924_v12  ;;  %v727_v3 = vsub.f32 %v1817_v15, %v726_v35  ;;  %v798_v15 = vand.u32 4294901760, %v1899_v1  ;;  %v751_v35 = vsub.f32 %v1841_v29, %v750_v49 }
 0x11f   :  { %1593 = vmatpush1.bf16.msra.mxu1 %v1592_v8  ;;  %v1972_v8 = vpack.c.bf16 %v786_v58, %v774_v57 }
 0x120   :  { %937 = vmatprep.subr.mxu1 %v1927_v17  ;;  %v752_v49 = vand.u32 4294901760, %v751_v35 }
 0x121   :  { %1561 = vmatpush1.bf16.msra.mxu0 %v1936_v19 }
 0x122   :  { %646 = vmatprep.subr.mxu0 %v1919_v10 }
 0x123   :  { %940 = vmatpush1.msra.mxu1 %v1930_v18 }
 0x124   :  { %1595 = vmatprep.subr.bf16.mxu1 %v1861_v41 }
 0x125   :  { %648 = vmatpush1.msra.mxu0 %v1921_v11 }
 0x126   :  { %1563 = vmatprep.subr.bf16.mxu0 %v1562_v26 }
 0x1a5   :  { %v575_v31 = vpop.xlane.xlu0 %574 }
 0x1a6   :  { %v577_v32 = vadd.f32 1e-08, %v575_v31 }
 0x1a8   :  { %1680 = vrsqrt.f32 %v577_v32  ;;  %v728_v32 = vand.u32 4294901760, %v727_v3  ;;  %v787_v3 = vsub.f32 %v1871_v46, %v786_v58  ;;  %v811_v46 = vsub.f32 %v1901_v2, %v810_v16 }
 0x1a9   :  { %v572_v33 = vpop.xlane.xlu0 %571 }
 0x1aa   :  { %v576_v34 = vadd.f32 1e-08, %v572_v33  ;;  %v1564_v30 = vpack.c.bf16 %v740_v28, %v728_v32  ;;  %v812_v32 = vand.u32 4294901760, %v811_v46  ;;  %v822_v28 = vand.u32 4294901760, %v1930_v18 }
 0x1ac   :  { %1682 = vrsqrt.f32 %v576_v34  ;;  %v1986_v34 = vpack.c.bf16 %v810_v16, %v798_v15  ;;  %v823_v35 = vsub.f32 %v1930_v18, %v822_v28 }
 0x1b2   :  { %v1681_v38 = vpop.eup %1680 }
 0x1b3   :  { %v581_v47 = vmul.f32 %v1681_v38, %v1791_v62  ;;  %v746_v38 = vand.u32 4294901760, %v745_v23  ;;  %v1568_v23 = vpack.c.bf16 %v764_v50, %v752_v49 }
 0x1b5   :  { %584 = vrot.lane.b32.xlu1 %v581_v47, %s1688_s0  ;;  %v1566_v42 = vpack.c.bf16 %v758_v39, %v746_v38  ;;  %v1689_v38 = vmov 0  }
 0x1b6   :  { %v1683_v53 = vpop.eup %1682  ;;  %1678 = vset.pattern.permute.xlu1 %v1689_v38  ;;  %1679 = vset.pattern.permute.xlu0 %v1689_v38 }
 0x1b7   :  { %v580_v62 = vmul.f32 %v1683_v53, %v1793_v63  ;;  %v804_v63 = vand.u32 4294901760, %v1895_v61  ;;  %v781_v53 = vsub.f32 %v1865_v43, %v780_v56 }
 0x1b9   :  { %v582_v22 = vsel %vm569_vm2, %v580_v62, 0.0  ;;  %v1984_v33 = vpack.c.bf16 %v804_v63, %v792_v25  ;;  %v775_v62 = vsub.f32 %v1869_v45, %v774_v57  ;;  %v782_v56 = vand.u32 4294901760, %v781_v53  ;;  %1363 = vperm.xlu1 %1678, %v1339_v13  }
 0x1ba   :  { %v608_v26 = vsel %vm606_vm3, %v582_v22, 0  ;;  %v805_v22 = vsub.f32 %v1895_v61, %v804_v63  ;;  %v799_v45 = vsub.f32 %v1899_v1, %v798_v15  ;;  %v816_v61 = vand.u32 4294901760, %v1927_v17 }
 0x1bb   :  { %v1982_v31 = vand.u32 4294901760, %v608_v26  ;;  %v776_v24 = vand.u32 4294901760, %v775_v62  ;;  %v1570_v57 = vpack.c.bf16 %v782_v56, %v770_v54  ;;  %v1610_v15 = vpack.c.bf16 %v732_v21, %v720_v20 }
 0x1bc   :  { %v806_v58 = vand.u32 4294901760, %v805_v22  ;;  %v800_v63 = vand.u32 4294901760, %v799_v45  ;;  %v817_v2 = vsub.f32 %v1927_v17, %v816_v61  ;;  %v824_v17 = vand.u32 4294901760, %v823_v35 }
 0x1bd   :  { %v1989_v27 = vsub.f32 %v608_v26, %v1982_v31  ;;  %v788_v26 = vand.u32 4294901760, %v787_v3 }
 0x1be   :  { %v1574_v1 = vpack.c.bf16 %v806_v58, %v794_v60  ;;  %v1576_v16 = vpack.c.bf16 %v812_v32, %v800_v63  ;;  %v818_v36 = vand.u32 4294901760, %v817_v2 }
 0x1bf   :  { %990 = vmatmul.mubr.f32.vlgmr.msra.gmra.mrb[2].mxu1 %v1989_v27  ;;  %v698_v47 = vand.u32 4294901760, %v1989_v27  ;;  %v1572_v25 = vpack.c.bf16 %v788_v26, %v776_v24 }
 0x1c0   :  { %1597 = vmatpush1.bf16.msra.mxu1 %v1867_v44  ;;  %995 = vmatprep.mubr.f32.mxu1 %v1686_v4 }
 0x1c1   :  { %v699_v29 = vsub.f32 %v1989_v27, %v698_v47  ;;  %1599 = vmatprep.subr.bf16.mxu1 %v1891_v59 }
 0x1c3   :  { %v700_v43 = vand.u32 4294901760, %v699_v29 }
 0x1c4   :  { %1601 = vmatpush1.bf16.msra.mxu1 %v1897_v0 }
 0x1c5   :  { %701 = vmatmul.mubr.f32.vlgmr.msra.gmra.mrb[2].mxu0 %v700_v43  ;;  %1603 = vmatprep.subr.bf16.mxu1 %v1906_v5 }
 0x1c6   :  { %1565 = vmatpush1.bf16.msra.mxu0 %v1564_v30  ;;  %706 = vmatprep.mubr.f32.mxu0 %v1686_v4 }
 0x1c7   :  { %1567 = vmatprep.subr.bf16.mxu0 %v1566_v42 }
 0x1c8   :  { %1605 = vmatpush1.bf16.msra.mxu1 %v1917_v9 }
 0x1c9   :  { %1607 = vmatprep.subr.bf16.mxu1 %v1924_v12 }
 0x1ca   :  { %1569 = vmatpush1.bf16.msra.mxu0 %v1568_v23 }
 0x1cb   :  { %1571 = vmatprep.subr.bf16.mxu0 %v1570_v57 }
 0x1cc   :  { %1609 = vmatpush1.bf16.msra.mxu1 %v1936_v19 }
 0x1cd   :  { %1037 = vmatprep.subr.mxu1 %v1919_v10 }
 0x1ce   :  { %1573 = vmatpush1.bf16.msra.mxu0 %v1572_v25 }
 0x1cf   :  { %1575 = vmatprep.subr.bf16.mxu0 %v1574_v1 }
 0x1d0   :  { %1039 = vmatpush1.msra.mxu1 %v1921_v11 }
 0x1d1   :  { %1611 = vmatprep.subr.bf16.mxu1 %v1610_v15 }
 0x1d2   :  { %1577 = vmatpush1.bf16.msra.mxu0 %v1576_v16 }
 0x1d3   :  { %819 = vmatprep.subr.mxu0 %v818_v36 }
 0x1d6   :  { %825 = vmatpush1.msra.mxu0 %v824_v17 }
 0x227   :  { %v585_v14 = vpop.permute.xlu1 %584 }
 0x228   :  { %v587_v18 = vsel %vm569_vm2, 0.0, %v585_v14 }
 0x229   :  { %v611_v20 = vsel %vm606_vm3, %v587_v18, 0 }
 0x22a   :  { %v707_v21 = vand.u32 4294901760, %v611_v20 }
 0x22c   :  { %v708_v39 = vsub.f32 %v611_v20, %v707_v21 }
 0x22e   :  { %998 = vmatmul.mubr.f32.gmra.mrb[4].mxu1 %v708_v39  ;;  %v709_v40 = vand.u32 4294901760, %v708_v39 }
 0x22f   :  { %1086 = vmatprep.mubr.f32.mxu1 %v1686_v4 }
 0x230   :  { %v710_v53 = vsub.f32 %v708_v39, %v709_v40 }
 0x232   :  { %1090 = vmatmul.mubr.f32.vlgmr.msra.gmra.mrb[2].mxu1 %v698_v47  ;;  %v711_v29 = vand.u32 4294901760, %v710_v53 }
 0x233   :  { %1613 = vmatpush1.bf16.msra.mxu1 %v1952_v37  ;;  %1095 = vmatprep.mubr.f32.mxu1 %v1686_v4  ;;  %v1382_v37 = vsub.s32 3, %v1780_v48 }
 0x234   :  { %712 = vmatmul.mubr.f32.gmra.mrb[4].mxu0 %v711_v29  ;;  %1615 = vmatprep.subr.bf16.mxu1 %v1959_v51 }
 0x235   :  { %872 = vmatprep.mubr.f32.mxu0 %v1686_v4 }
 0x236   :  { %1099 = vmatmul.mubr.f32.gmra.mrb[4].mxu1 %v709_v40 }
 0x237   :  { %1617 = vmatpush1.bf16.msra.mxu1 %v1961_v52  ;;  %1223 = vmatprep.mubr.f32.mxu1 %v1686_v4 }
 0x238   :  { %874 = vmatmul.mubr.f32.vlgmr.msra.gmra.mrb[2].mxu0 %v1982_v31  ;;  %1619 = vmatprep.subr.bf16.mxu1 %v1970_v7  ;;  %v1364_v47 = vpop.permute.xlu1 %1363 }
 0x239   :  { %879 = vmatprep.mubr.f32.mxu0 %v1686_v4 }
 0x23b   :  { %1621 = vmatpush1.bf16.msra.mxu1 %v1972_v8 }
 0x23c   :  { %881 = vmatmul.mubr.f32.gmra.mrb[4].mxu0 %v707_v21  ;;  %1623 = vmatprep.subr.bf16.mxu1 %v1984_v33 }
 0x23f   :  { %1625 = vmatpush1.bf16.msra.mxu1 %v1986_v34 }
 0x240   :  { %1172 = vmatprep.subr.mxu1 %v816_v61 }
 0x243   :  { %1176 = vmatpush1.msra.mxu1 %v822_v28 }
 0x244   :  { %1225 = vmatmul.mubr.f32.vlgmr.msra.gmra.mrb[2].mxu1 %v1982_v31  ;;  %1627 = vmatprep.subr.bf16.mxu1 %v1861_v41 }
 0x245   :  { %1629 = vmatpush1.bf16.msra.mxu1 %v1867_v44  ;;  %1230 = vmatprep.mubr.f32.mxu1 %v1686_v4 }
 0x246   :  { %1631 = vmatprep.subr.bf16.mxu1 %v1891_v59 }
 0x248   :  { %1232 = vmatmul.mubr.f32.gmra.mrb[4].mxu1 %v707_v21 }
 0x249   :  { %1633 = vmatpush1.bf16.msra.mxu1 %v1897_v0  ;;  %1320 = vmatprep.mubr.f32.mxu1 %v1686_v4 }
 0x24a   :  { %1635 = vmatprep.subr.bf16.mxu1 %v1906_v5  ;;  %v1336_v5 = vld [vmem:[%s2090_s5] sm:$0xf] }
 0x24d   :  { %1637 = vmatpush1.bf16.msra.mxu1 %v1917_v9  ;;  %v1337_v9 = vstv %s2091_s6 }
 0x24e   :  { %1639 = vmatprep.subr.bf16.mxu1 %v1924_v12 }
 0x251   :  { %1641 = vmatpush1.bf16.msra.mxu1 %v1936_v19 }
 0x252   :  { %1271 = vmatprep.subr.mxu1 %v1919_v10  ;;  %v1338_v10 = vmul.f32 %v1337_v9, %v1336_v5 }
 0x254   :  { %v1344_v12 = vrot.slane %v1338_v10, %v1784_v55 }
 0x255   :  { %1273 = vmatpush1.msra.mxu1 %v1921_v11  ;;  %v1347_v11 = vsub.s32 2, %v1780_v48 }
 0x256   :  { %1322 = vmatmul.mubr.f32.vlgmr.msra.gmra.mrb[2].mxu1 %v1982_v31  ;;  %v1354_v51 = vrot.slane %v1344_v12, %v1784_v55  ;;  %v1383_v31 = vrot.slane %v1338_v10, %v1382_v37 }
 0x257   :  { %1327 = vmatprep.mubr.f32.mxu1 %v1686_v4  ;;  %v1378_v4 = vsub.s32 1, %v1780_v48  ;;  %v1348_v19 = vrot.slane %v1338_v10, %v1347_v11 }
 0x259   :  { %v1379_v52 = vrot.slane %v1338_v10, %v1378_v4  ;;  %v1358_v8 = vrot.slane %v1348_v19, %v1784_v55  ;;  %v1393_v54 = vrot.slane %v1383_v31, %v1378_v4 }
 0x25a   :  { %1329 = vmatmul.mubr.f32.gmra.mrb[4].mxu1 %v707_v21 }
 0x25b   :  { %v1389_v49 = vrot.slane %v1379_v52, %v1378_v4 }
 0x30b   :  { %v875_v41 = vpop.f32.mrb[2].mxu0 }
 0x30c   :  { %v877_v44 = vpop.f32.mrb[3].mxu0 }
 0x30f   :  { %v882_v59 = vpop.f32.mrb[4].mxu0 }
 0x310   :  { %v884_v0 = vpop.f32.mrb[5].mxu0 }
 0x329   :  { %v1323_v7 = vpop.f32.mrb[2].mxu1 }
 0x32a   :  { %v1644_v33 = vadd.f32 %v1323_v7, %v875_v41  ;;  %v1325_v34 = vpop.f32.mrb[3].mxu1 }
 0x32b   :  { %v1645_v27 = vadd.f32 %v1325_v34, %v877_v44 }
 0x32c   :  { %v1359_v30 = vadd.f32 %v1644_v33, %v1354_v51 }
 0x32d   :  { %v1360_v50 = vadd.f32 %v1645_v27, %v1358_v8  ;;  %v1330_v42 = vpop.f32.mrb[4].mxu1 }
 0x32e   :  { %v1366_v62 = vadd.f32 %v1364_v47, %v1359_v30  ;;  %v1646_v3 = vadd.f32 %v1330_v42, %v882_v59  ;;  %v1332_v43 = vpop.f32.mrb[5].mxu1 }
 0x32f   :  { %v1367_v48 = vadd.f32 %v1364_v47, %v1360_v50  ;;  %v1647_v56 = vadd.f32 %v1332_v43, %v884_v0 }
 0x330   :  { %v1368_v6 = vmul.f32 0.2, %v1366_v62  ;;  %v1394_v22 = vadd.f32 %v1646_v3, %v1389_v49 }
 0x331   :  { %v1369_v23 = vmul.f32 0.2, %v1367_v48  ;;  %v1395_v24 = vadd.f32 %v1647_v56, %v1393_v54 }
 0x332   :  { %v1370_v55 = vmax.f32 %v1366_v62, %v1368_v6  ;;  %v1396_v26 = vadd.f32 %v1394_v22, %v1364_v47 }
 0x333   :  { %v1371_v45 = vmax.f32 %v1367_v48, %v1369_v23  ;;  %v1397_v46 = vadd.f32 %v1395_v24, %v1364_v47 }
 0x334   :  { %v1372_v57 = vmul.f32 1.4142135, %v1370_v55  ;;  %v1398_v60 = vmul.f32 0.2, %v1396_v26 }
 0x335   :  { %v1373_v58 = vmul.f32 1.4142135, %v1371_v45  ;;  %v1399_v61 = vmul.f32 0.2, %v1397_v46 }
 0x336   :  { %1374 = vst [vmem:[%s2092_s8] sm:$0xff] %v1372_v57  ;;  %v1400_v25 = vmax.f32 %v1396_v26, %v1398_v60 }
 0x337   :  { %1375 = vst [vmem:[%s2092_s8 + $0x8] sm:$0xff] %v1373_v58  ;;  %v1401_v63 = vmax.f32 %v1397_v46, %v1399_v61 }
 0x338   :  { %v1402_v32 = vmul.f32 1.4142135, %v1400_v25 }
 0x339   :  { %v1403_v28 = vmul.f32 1.4142135, %v1401_v63 }
 0x33a   :  { %1412 = vst [vmem:[%s2092_s8 + $0x10] sm:$0xff] %v1402_v32 }
 0x33b   :  { %1413 = vst [vmem:[%s2092_s8 + $0x18] sm:$0xff] %v1403_v28 }

</bundles_post_ra>
